<compile_context>
chip_gen: v6e
topology: v6e:2x2x1
jax: 0.10.0
libtpu: 0.0.40
codegen_flags: <defaults>
</compile_context>

<pallas_src>
import functools

import jax
import jax.numpy as jnp
from jax.experimental import pallas as pl
from jax.experimental.pallas import tpu as pltpu

BN_EPS = 1e-5


# ---------------------------------------------------------------------------
# Fused kernel
# ---------------------------------------------------------------------------
def _encoder_kernel(x_ref, gamma_ref, beta_ref, w_ref, b_ref, out_ref,
                    *, n_layers: int, b_real: int, split_col: int, mxu_dtype):
    """Whole encoder in one kernel.

    x_ref:     (B_pad, D_pad)      sqrt is applied in-kernel
    gamma_ref: (L, 1, D_pad)       BN weight  (zero in padded cols)
    beta_ref:  (L, 1, D_pad)       BN bias    (zero in padded cols)
    w_ref:     (L, D_pad, D_pad)   Linear weight, stored (in, out), zero padded
    b_ref:     (L, 1, D_pad)       Linear bias, zero padded
    out_ref:   (B_pad, D_pad)      cols [:split_col]      -> q_m
                                   cols [split_col:2*sc]  -> softplus(q_v)
    """
    h = x_ref[...].astype(jnp.float32)
    b_pad, d_pad = h.shape
    masked = b_real < b_pad  # static Python bool

    if masked:
        row_mask = jax.lax.broadcasted_iota(jnp.int32, (b_pad, 1), 0) < b_real
        h = jnp.where(row_mask, h, 0.0)

    # 1) transform counts with sqrt
    h = jnp.sqrt(h)

    inv_n = jnp.float32(1.0 / b_real)
    for l in range(n_layers):  # static unroll; each layer's params are distinct
        # --- BatchNorm1d, training mode (batch mean, biased batch variance) ---
        if masked:
            mean = jnp.sum(h, axis=0, keepdims=True) * inv_n
            centered = jnp.where(row_mask, h - mean, 0.0)
            var = jnp.sum(centered * centered, axis=0, keepdims=True) * inv_n
        else:
            mean = jnp.mean(h, axis=0, keepdims=True)
            centered = h - mean
            var = jnp.mean(centered * centered, axis=0, keepdims=True)
        xn = centered * jax.lax.rsqrt(var + BN_EPS)
        xn = xn * gamma_ref[l] + beta_ref[l]

        # --- ReLU ---
        act = jnp.maximum(xn, 0.0)
        if masked:
            act = jnp.where(row_mask, act, 0.0)  # keep padded rows inert for next BN

        # --- Linear: bf16 into the MXU, f32 accumulation ---
        h = (jnp.dot(act.astype(mxu_dtype), w_ref[l].astype(mxu_dtype),
                     preferred_element_type=jnp.float32)
             + b_ref[l])

    # Head: apply softplus to the q_v half (cols >= split_col) with a lane mask so the
    # store stays a single lane-dense (B_pad, 128) write.  Padding cols are discarded
    # by the wrapper.
    col_ids = jax.lax.broadcasted_iota(jnp.int32, (1, d_pad), 1)
    out_ref[...] = jnp.where(col_ids >= split_col, jax.nn.softplus(h), h)


# ---------------------------------------------------------------------------
# Parameter init / packing
# ---------------------------------------------------------------------------
def _round_up(v: int, m: int) -> int:
    return (v + m - 1) // m * m


def init_encoder_params(key, n_input, n_output, layers):
    """Logical (unpadded) parameters mirroring the PyTorch module shapes."""
    dims = [n_input] + list(layers) + [2 * n_output + 2]
    params = []
    for din, dout in zip(dims, dims[1:]):
        key, kw, kb = jax.random.split(key, 3)
        bound = 1.0 / (din ** 0.5)
        params.append(dict(
            gamma=jnp.ones((din,), jnp.float32),    # BatchNorm1d.weight
            beta=jnp.zeros((din,), jnp.float32),    # BatchNorm1d.bias
            # Linear weight stored (in, out) = PyTorch weight.T
            w=jax.random.uniform(kw, (din, dout), jnp.float32, -bound, bound),
            b=jax.random.uniform(kb, (dout,), jnp.float32, -bound, bound),
        ))
    return params, dims


def pack_encoder_params(params, dims):
    """Zero-pad every layer to a common 128-lane width and stack along a layer axis."""
    d_pad = max(_round_up(d, 128) for d in dims)
    n_layers = len(params)
    gamma = jnp.zeros((n_layers, 1, d_pad), jnp.float32)
    beta = jnp.zeros((n_layers, 1, d_pad), jnp.float32)
    w = jnp.zeros((n_layers, d_pad, d_pad), jnp.float32)
    b = jnp.zeros((n_layers, 1, d_pad), jnp.float32)
    for l, p in enumerate(params):
        din, dout = p["w"].shape
        gamma = gamma.at[l, 0, :din].set(p["gamma"])
        beta = beta.at[l, 0, :din].set(p["beta"])
        w = w.at[l, :din, :dout].set(p["w"])
        b = b.at[l, 0, :dout].set(p["b"])
    return dict(gamma=gamma, beta=beta, w=w, b=b), d_pad


# ---------------------------------------------------------------------------
# Wrapper: one fused pallas_call + cheap narrow slicing outside the kernel
# ---------------------------------------------------------------------------
def encoder_forward(packed, d_pad, x, n_latent, *, mxu_dtype=jnp.bfloat16):
    B, n_input = x.shape
    n_layers = packed["w"].shape[0]
    b_pad = _round_up(max(B, 8), 8)         # sublane multiple; BN stats use only B rows
    split_col = n_latent + 1                # width of each half of the head

    x_pad = jnp.zeros((b_pad, d_pad), jnp.float32).at[:B, :n_input].set(x)

    kernel = functools.partial(
        _encoder_kernel, n_layers=n_layers, b_real=B,
        split_col=split_col, mxu_dtype=mxu_dtype)

    out = pl.pallas_call(
        kernel,
        out_shape=jax.ShapeDtypeStruct((b_pad, d_pad), jnp.float32),
        grid=(1,),
        in_specs=[
            pl.BlockSpec((b_pad, d_pad), lambda i: (0, 0)),
            pl.BlockSpec((n_layers, 1, d_pad), lambda i: (0, 0, 0)),
            pl.BlockSpec((n_layers, 1, d_pad), lambda i: (0, 0, 0)),
            pl.BlockSpec((n_layers, d_pad, d_pad), lambda i: (0, 0, 0)),
            pl.BlockSpec((n_layers, 1, d_pad), lambda i: (0, 0, 0)),
        ],
        out_specs=pl.BlockSpec((b_pad, d_pad), lambda i: (0, 0)),
        compiler_params=pltpu.CompilerParams(dimension_semantics=("arbitrary",)),
    )(x_pad, packed["gamma"], packed["beta"], packed["w"], packed["b"])

    # Narrow, non-lane-aligned slices happen here (outside the kernel).
    q_m = out[:B, :split_col]                       # raw mean half
    q_v_sp = out[:B, split_col:2 * split_col]       # softplus already applied in-kernel
    z_loc, z_scale = q_m[:, :-1], q_v_sp[:, :-1]
    l_loc, l_scale = q_m[:, -1:], q_v_sp[:, -1:]
    return z_loc, z_scale, l_loc, l_scale


# ---------------------------------------------------------------------------
# Pure-JAX references
# ---------------------------------------------------------------------------
def encoder_reference(params, x, *, mxu_dtype=None):
    """Exact forward semantics; optionally emulates the bf16-into-MXU cast."""
    h = jnp.sqrt(x)
    for p in params:
        mean = jnp.mean(h, axis=0, keepdims=True)
        centered = h - mean
        var = jnp.mean(centered * centered, axis=0, keepdims=True)
        h = centered * jax.lax.rsqrt(var + BN_EPS) * p["gamma"] + p["beta"]
        h = jnp.maximum(h, 0.0)
        if mxu_dtype is not None:
            h = jnp.dot(h.astype(mxu_dtype), p["w"].astype(mxu_dtype),
                        preferred_element_type=jnp.float32) + p["b"]
        else:
            h = h @ p["w"] + p["b"]
    d = h.shape[-1] // 2
    q_m, q_v = h[:, :d], h[:, d:]
    return (q_m[:, :-1], jax.nn.softplus(q_v[:, :-1]),
            q_m[:, -1:], jax.nn.softplus(q_v[:, -1:]))


if __name__ == "__main__":
    key = jax.random.PRNGKey(0)

    # Small shapes consistent with the module: dims = [32, 64, 48, 2*8+2=18]
    B, n_input, n_output = 8, 32, 8
    layers = (64, 48)

    key, k_param, k_x = jax.random.split(key, 3)
    params, dims = init_encoder_params(k_param, n_input, n_output, layers)
    packed, d_pad = pack_encoder_params(params, dims)

    # Non-negative "counts" so sqrt is well defined.
    x = jax.random.uniform(k_x, (B, n_input), jnp.float32, 0.0, 10.0)

    outs = encoder_forward(packed, d_pad, x, n_output)
    jax.block_until_ready(outs)

    # Tight check vs a reference that matches the kernel's bf16-MXU cast, and a looser
    # semantic check vs the exact f32 PyTorch-equivalent forward.
    ref_bf16 = encoder_reference(params, x, mxu_dtype=jnp.bfloat16)
    ref_f32 = encoder_reference(params, x)
    names = ("z_loc", "z_scale", "l_loc", "l_scale")
    for name, got, want_b, want_f in zip(names, outs, ref_bf16, ref_f32):
        assert got.shape == want_f.shape, (name, got.shape, want_f.shape)
        assert jnp.allclose(got, want_b, rtol=3e-3, atol=3e-3), f"{name} mismatch vs bf16 ref"
        assert jnp.allclose(got, want_f, rtol=5e-2, atol=5e-2), f"{name} mismatch vs f32 ref"

    print("KERNEL_OK")
</pallas_src>

<mosaic_0001>
module attributes {stable_mosaic.version = 11 : i64} {
  func.func @_encoder_kernel(%arg0: i32, %arg1: memref<8x128xf32, #tpu.memory_space<vmem>>, %arg2: memref<3x1x128xf32, #tpu.memory_space<vmem>>, %arg3: memref<3x1x128xf32, #tpu.memory_space<vmem>>, %arg4: memref<3x128x128xf32, #tpu.memory_space<vmem>>, %arg5: memref<3x1x128xf32, #tpu.memory_space<vmem>>, %arg6: memref<8x128xf32, #tpu.memory_space<vmem>>) attributes {dimension_semantics = [#tpu.dimension_semantics<arbitrary>], iteration_bounds = array<i64: 1>, scalar_prefetch = 0 : i64, scratch_operands = 0 : i64, tpu.core_type = #tpu.core_type<tc>, window_params = [{pipeline_mode = #tpu.pipeline_mode<synchronous>, transform_indices = @transform_0, window_bounds = array<i64: 8, 128>}, {pipeline_mode = #tpu.pipeline_mode<synchronous>, transform_indices = @transform_1, window_bounds = array<i64: 3, 1, 128>}, {pipeline_mode = #tpu.pipeline_mode<synchronous>, transform_indices = @transform_2, window_bounds = array<i64: 3, 1, 128>}, {pipeline_mode = #tpu.pipeline_mode<synchronous>, transform_indices = @transform_3, window_bounds = array<i64: 3, 128, 128>}, {pipeline_mode = #tpu.pipeline_mode<synchronous>, transform_indices = @transform_4, window_bounds = array<i64: 3, 1, 128>}, {pipeline_mode = #tpu.pipeline_mode<synchronous>, transform_indices = @transform_5, window_bounds = array<i64: 8, 128>}]} {
    %c0 = arith.constant 0 : index
    %c0_0 = arith.constant 0 : index
    %0 = vector.load %arg1[%c0, %c0_0] : memref<8x128xf32, #tpu.memory_space<vmem>>, vector<8x128xf32>
    %1 = math.sqrt %0 : vector<8x128xf32>
    %cst = arith.constant dense<0.000000e+00> : vector<128xf32>
    %2 = vector.multi_reduction <add>, %1, %cst [0] : vector<8x128xf32> to vector<128xf32>
    %3 = vector.shape_cast %2 : vector<128xf32> to vector<1x128xf32>
    %cst_1 = arith.constant 8.000000e+00 : f32
    %4 = vector.broadcast %cst_1 : f32 to vector<1x128xf32>
    %5 = arith.divf %3, %4 : vector<1x128xf32>
    %6 = vector.broadcast %5 : vector<1x128xf32> to vector<8x128xf32>
    %7 = arith.subf %1, %6 : vector<8x128xf32>
    %8 = arith.mulf %7, %7 : vector<8x128xf32>
    %cst_2 = arith.constant dense<0.000000e+00> : vector<128xf32>
    %9 = vector.multi_reduction <add>, %8, %cst_2 [0] : vector<8x128xf32> to vector<128xf32>
    %10 = vector.shape_cast %9 : vector<128xf32> to vector<1x128xf32>
    %cst_3 = arith.constant 8.000000e+00 : f32
    %11 = vector.broadcast %cst_3 : f32 to vector<1x128xf32>
    %12 = arith.divf %10, %11 : vector<1x128xf32>
    %cst_4 = arith.constant 9.99999974E-6 : f32
    %13 = vector.broadcast %cst_4 : f32 to vector<1x128xf32>
    %14 = arith.addf %12, %13 : vector<1x128xf32>
    %15 = math.rsqrt %14 : vector<1x128xf32>
    %16 = vector.broadcast %15 : vector<1x128xf32> to vector<8x128xf32>
    %17 = arith.mulf %7, %16 : vector<8x128xf32>
    %c0_5 = arith.constant 0 : index
    %c0_6 = arith.constant 0 : index
    %c0_7 = arith.constant 0 : index
    %18 = vector.load %arg2[%c0_5, %c0_6, %c0_7] : memref<3x1x128xf32, #tpu.memory_space<vmem>>, vector<1x1x128xf32>
    %19 = vector.shape_cast %18 : vector<1x1x128xf32> to vector<1x128xf32>
    %20 = vector.broadcast %19 : vector<1x128xf32> to vector<8x128xf32>
    %21 = arith.mulf %17, %20 : vector<8x128xf32>
    %c0_8 = arith.constant 0 : index
    %c0_9 = arith.constant 0 : index
    %c0_10 = arith.constant 0 : index
    %22 = vector.load %arg3[%c0_8, %c0_9, %c0_10] : memref<3x1x128xf32, #tpu.memory_space<vmem>>, vector<1x1x128xf32>
    %23 = vector.shape_cast %22 : vector<1x1x128xf32> to vector<1x128xf32>
    %24 = vector.broadcast %23 : vector<1x128xf32> to vector<8x128xf32>
    %25 = arith.addf %21, %24 : vector<8x128xf32>
    %cst_11 = arith.constant 0.000000e+00 : f32
    %26 = vector.broadcast %cst_11 : f32 to vector<8x128xf32>
    %27 = arith.maximumf %25, %26 : vector<8x128xf32>
    %28 = arith.truncf %27 : vector<8x128xf32> to vector<8x128xbf16>
    %c0_12 = arith.constant 0 : index
    %c0_13 = arith.constant 0 : index
    %c0_14 = arith.constant 0 : index
    %29 = vector.load %arg4[%c0_12, %c0_13, %c0_14] : memref<3x128x128xf32, #tpu.memory_space<vmem>>, vector<1x128x128xf32>
    %30 = vector.shape_cast %29 : vector<1x128x128xf32> to vector<128x128xf32>
    %31 = arith.truncf %30 : vector<128x128xf32> to vector<128x128xbf16>
    %cst_15 = arith.constant dense<0.000000e+00> : vector<8x128xf32>
    %32 = tpu.matmul %28, %31, %cst_15 {dimension_numbers = #tpu.dot_dimension_numbers<[1], [0], [0], [1], [0, 0, 1, 1], [], []>} : vector<8x128xbf16>, vector<128x128xbf16>, vector<8x128xf32> -> vector<8x128xf32>
    %c0_16 = arith.constant 0 : index
    %c0_17 = arith.constant 0 : index
    %c0_18 = arith.constant 0 : index
    %33 = vector.load %arg5[%c0_16, %c0_17, %c0_18] : memref<3x1x128xf32, #tpu.memory_space<vmem>>, vector<1x1x128xf32>
    %34 = vector.shape_cast %33 : vector<1x1x128xf32> to vector<1x128xf32>
    %35 = vector.broadcast %34 : vector<1x128xf32> to vector<8x128xf32>
    %36 = arith.addf %32, %35 : vector<8x128xf32>
    %cst_19 = arith.constant dense<0.000000e+00> : vector<128xf32>
    %37 = vector.multi_reduction <add>, %36, %cst_19 [0] : vector<8x128xf32> to vector<128xf32>
    %38 = vector.shape_cast %37 : vector<128xf32> to vector<1x128xf32>
    %cst_20 = arith.constant 8.000000e+00 : f32
    %39 = vector.broadcast %cst_20 : f32 to vector<1x128xf32>
    %40 = arith.divf %38, %39 : vector<1x128xf32>
    %41 = vector.broadcast %40 : vector<1x128xf32> to vector<8x128xf32>
    %42 = arith.subf %36, %41 : vector<8x128xf32>
    %43 = arith.mulf %42, %42 : vector<8x128xf32>
    %cst_21 = arith.constant dense<0.000000e+00> : vector<128xf32>
    %44 = vector.multi_reduction <add>, %43, %cst_21 [0] : vector<8x128xf32> to vector<128xf32>
    %45 = vector.shape_cast %44 : vector<128xf32> to vector<1x128xf32>
    %cst_22 = arith.constant 8.000000e+00 : f32
    %46 = vector.broadcast %cst_22 : f32 to vector<1x128xf32>
    %47 = arith.divf %45, %46 : vector<1x128xf32>
    %cst_23 = arith.constant 9.99999974E-6 : f32
    %48 = vector.broadcast %cst_23 : f32 to vector<1x128xf32>
    %49 = arith.addf %47, %48 : vector<1x128xf32>
    %50 = math.rsqrt %49 : vector<1x128xf32>
    %51 = vector.broadcast %50 : vector<1x128xf32> to vector<8x128xf32>
    %52 = arith.mulf %42, %51 : vector<8x128xf32>
    %c1 = arith.constant 1 : index
    %c0_24 = arith.constant 0 : index
    %c0_25 = arith.constant 0 : index
    %53 = vector.load %arg2[%c1, %c0_24, %c0_25] : memref<3x1x128xf32, #tpu.memory_space<vmem>>, vector<1x1x128xf32>
    %54 = vector.shape_cast %53 : vector<1x1x128xf32> to vector<1x128xf32>
    %55 = vector.broadcast %54 : vector<1x128xf32> to vector<8x128xf32>
    %56 = arith.mulf %52, %55 : vector<8x128xf32>
    %c1_26 = arith.constant 1 : index
    %c0_27 = arith.constant 0 : index
    %c0_28 = arith.constant 0 : index
    %57 = vector.load %arg3[%c1_26, %c0_27, %c0_28] : memref<3x1x128xf32, #tpu.memory_space<vmem>>, vector<1x1x128xf32>
    %58 = vector.shape_cast %57 : vector<1x1x128xf32> to vector<1x128xf32>
    %59 = vector.broadcast %58 : vector<1x128xf32> to vector<8x128xf32>
    %60 = arith.addf %56, %59 : vector<8x128xf32>
    %cst_29 = arith.constant 0.000000e+00 : f32
    %61 = vector.broadcast %cst_29 : f32 to vector<8x128xf32>
    %62 = arith.maximumf %60, %61 : vector<8x128xf32>
    %63 = arith.truncf %62 : vector<8x128xf32> to vector<8x128xbf16>
    %c1_30 = arith.constant 1 : index
    %c0_31 = arith.constant 0 : index
    %c0_32 = arith.constant 0 : index
    %64 = vector.load %arg4[%c1_30, %c0_31, %c0_32] : memref<3x128x128xf32, #tpu.memory_space<vmem>>, vector<1x128x128xf32>
    %65 = vector.shape_cast %64 : vector<1x128x128xf32> to vector<128x128xf32>
    %66 = arith.truncf %65 : vector<128x128xf32> to vector<128x128xbf16>
    %cst_33 = arith.constant dense<0.000000e+00> : vector<8x128xf32>
    %67 = tpu.matmul %63, %66, %cst_33 {dimension_numbers = #tpu.dot_dimension_numbers<[1], [0], [0], [1], [0, 0, 1, 1], [], []>} : vector<8x128xbf16>, vector<128x128xbf16>, vector<8x128xf32> -> vector<8x128xf32>
    %c1_34 = arith.constant 1 : index
    %c0_35 = arith.constant 0 : index
    %c0_36 = arith.constant 0 : index
    %68 = vector.load %arg5[%c1_34, %c0_35, %c0_36] : memref<3x1x128xf32, #tpu.memory_space<vmem>>, vector<1x1x128xf32>
    %69 = vector.shape_cast %68 : vector<1x1x128xf32> to vector<1x128xf32>
    %70 = vector.broadcast %69 : vector<1x128xf32> to vector<8x128xf32>
    %71 = arith.addf %67, %70 : vector<8x128xf32>
    %cst_37 = arith.constant dense<0.000000e+00> : vector<128xf32>
    %72 = vector.multi_reduction <add>, %71, %cst_37 [0] : vector<8x128xf32> to vector<128xf32>
    %73 = vector.shape_cast %72 : vector<128xf32> to vector<1x128xf32>
    %cst_38 = arith.constant 8.000000e+00 : f32
    %74 = vector.broadcast %cst_38 : f32 to vector<1x128xf32>
    %75 = arith.divf %73, %74 : vector<1x128xf32>
    %76 = vector.broadcast %75 : vector<1x128xf32> to vector<8x128xf32>
    %77 = arith.subf %71, %76 : vector<8x128xf32>
    %78 = arith.mulf %77, %77 : vector<8x128xf32>
    %cst_39 = arith.constant dense<0.000000e+00> : vector<128xf32>
    %79 = vector.multi_reduction <add>, %78, %cst_39 [0] : vector<8x128xf32> to vector<128xf32>
    %80 = vector.shape_cast %79 : vector<128xf32> to vector<1x128xf32>
    %cst_40 = arith.constant 8.000000e+00 : f32
    %81 = vector.broadcast %cst_40 : f32 to vector<1x128xf32>
    %82 = arith.divf %80, %81 : vector<1x128xf32>
    %cst_41 = arith.constant 9.99999974E-6 : f32
    %83 = vector.broadcast %cst_41 : f32 to vector<1x128xf32>
    %84 = arith.addf %82, %83 : vector<1x128xf32>
    %85 = math.rsqrt %84 : vector<1x128xf32>
    %86 = vector.broadcast %85 : vector<1x128xf32> to vector<8x128xf32>
    %87 = arith.mulf %77, %86 : vector<8x128xf32>
    %c2 = arith.constant 2 : index
    %c0_42 = arith.constant 0 : index
    %c0_43 = arith.constant 0 : index
    %88 = vector.load %arg2[%c2, %c0_42, %c0_43] : memref<3x1x128xf32, #tpu.memory_space<vmem>>, vector<1x1x128xf32>
    %89 = vector.shape_cast %88 : vector<1x1x128xf32> to vector<1x128xf32>
    %90 = vector.broadcast %89 : vector<1x128xf32> to vector<8x128xf32>
    %91 = arith.mulf %87, %90 : vector<8x128xf32>
    %c2_44 = arith.constant 2 : index
    %c0_45 = arith.constant 0 : index
    %c0_46 = arith.constant 0 : index
    %92 = vector.load %arg3[%c2_44, %c0_45, %c0_46] : memref<3x1x128xf32, #tpu.memory_space<vmem>>, vector<1x1x128xf32>
    %93 = vector.shape_cast %92 : vector<1x1x128xf32> to vector<1x128xf32>
    %94 = vector.broadcast %93 : vector<1x128xf32> to vector<8x128xf32>
    %95 = arith.addf %91, %94 : vector<8x128xf32>
    %cst_47 = arith.constant 0.000000e+00 : f32
    %96 = vector.broadcast %cst_47 : f32 to vector<8x128xf32>
    %97 = arith.maximumf %95, %96 : vector<8x128xf32>
    %98 = arith.truncf %97 : vector<8x128xf32> to vector<8x128xbf16>
    %c2_48 = arith.constant 2 : index
    %c0_49 = arith.constant 0 : index
    %c0_50 = arith.constant 0 : index
    %99 = vector.load %arg4[%c2_48, %c0_49, %c0_50] : memref<3x128x128xf32, #tpu.memory_space<vmem>>, vector<1x128x128xf32>
    %100 = vector.shape_cast %99 : vector<1x128x128xf32> to vector<128x128xf32>
    %101 = arith.truncf %100 : vector<128x128xf32> to vector<128x128xbf16>
    %cst_51 = arith.constant dense<0.000000e+00> : vector<8x128xf32>
    %102 = tpu.matmul %98, %101, %cst_51 {dimension_numbers = #tpu.dot_dimension_numbers<[1], [0], [0], [1], [0, 0, 1, 1], [], []>} : vector<8x128xbf16>, vector<128x128xbf16>, vector<8x128xf32> -> vector<8x128xf32>
    %c2_52 = arith.constant 2 : index
    %c0_53 = arith.constant 0 : index
    %c0_54 = arith.constant 0 : index
    %103 = vector.load %arg5[%c2_52, %c0_53, %c0_54] : memref<3x1x128xf32, #tpu.memory_space<vmem>>, vector<1x1x128xf32>
    %104 = vector.shape_cast %103 : vector<1x1x128xf32> to vector<1x128xf32>
    %105 = vector.broadcast %104 : vector<1x128xf32> to vector<8x128xf32>
    %106 = arith.addf %102, %105 : vector<8x128xf32>
    %107 = tpu.iota {dimensions = array<i32: 1>} : vector<1x128xi32>
    %c9_i32 = arith.constant 9 : i32
    %108 = vector.broadcast %c9_i32 : i32 to vector<1x128xi32>
    %109 = arith.cmpi sge, %107, %108 : vector<1x128xi32>
    %cst_55 = arith.constant 0.000000e+00 : f32
    %110 = vector.broadcast %cst_55 : f32 to vector<8x128xf32>
    %111 = arith.maximumf %106, %110 : vector<8x128xf32>
    %112 = vector.broadcast %cst_55 : f32 to vector<8x128xf32>
    %113 = arith.subf %106, %112 : vector<8x128xf32>
    %114 = arith.cmpf one, %113, %113 : vector<8x128xf32>
    %115 = vector.broadcast %cst_55 : f32 to vector<8x128xf32>
    %116 = arith.addf %106, %115 : vector<8x128xf32>
    %117 = math.absf %113 : vector<8x128xf32>
    %cst_56 = arith.constant 0.000000e+00 : f32
    %118 = vector.broadcast %cst_56 : f32 to vector<8x128xf32>
    %119 = arith.subf %118, %117 : vector<8x128xf32>
    %120 = math.exp %119 : vector<8x128xf32>
    %121 = math.log1p %120 : vector<8x128xf32>
    %122 = arith.addf %111, %121 : vector<8x128xf32>
    %123 = arith.select %114, %116, %122 : vector<8x128xi1>, vector<8x128xf32>
    %124 = vector.shape_cast %109 : vector<1x128xi1> to vector<1x128xi1>
    %125 = vector.broadcast %124 : vector<1x128xi1> to vector<8x128xi1>
    %126 = arith.select %125, %123, %106 : vector<8x128xi1>, vector<8x128xf32>
    %c0_57 = arith.constant 0 : index
    %c0_58 = arith.constant 0 : index
    %127 = vector.load %arg6[%c0_57, %c0_58] : memref<8x128xf32, #tpu.memory_space<vmem>>, vector<8x128xf32>
    tpu.vector_store %arg6[%c0_57, %c0_58], %126 {strides = array<i32>} : memref<8x128xf32, #tpu.memory_space<vmem>>, vector<8x128xf32>,
    return
  }
  func.func @transform_0(%arg0: i32) -> (i32, i32) {
    %c0_i32 = arith.constant 0 : i32
    %c0_i32_0 = arith.constant 0 : i32
    %c0_i32_1 = arith.constant 0 : i32
    return %c0_i32, %c0_i32_0 : i32, i32
  }
  func.func @transform_1(%arg0: i32) -> (i32, i32, i32) {
    %c0_i32 = arith.constant 0 : i32
    %c0_i32_0 = arith.constant 0 : i32
    %c0_i32_1 = arith.constant 0 : i32
    %c0_i32_2 = arith.constant 0 : i32
    return %c0_i32, %c0_i32_0, %c0_i32_1 : i32, i32, i32
  }
  func.func @transform_2(%arg0: i32) -> (i32, i32, i32) {
    %c0_i32 = arith.constant 0 : i32
    %c0_i32_0 = arith.constant 0 : i32
    %c0_i32_1 = arith.constant 0 : i32
    %c0_i32_2 = arith.constant 0 : i32
    return %c0_i32, %c0_i32_0, %c0_i32_1 : i32, i32, i32
  }
  func.func @transform_3(%arg0: i32) -> (i32, i32, i32) {
    %c0_i32 = arith.constant 0 : i32
    %c0_i32_0 = arith.constant 0 : i32
    %c0_i32_1 = arith.constant 0 : i32
    %c0_i32_2 = arith.constant 0 : i32
    return %c0_i32, %c0_i32_0, %c0_i32_1 : i32, i32, i32
  }
  func.func @transform_4(%arg0: i32) -> (i32, i32, i32) {
    %c0_i32 = arith.constant 0 : i32
    %c0_i32_0 = arith.constant 0 : i32
    %c0_i32_1 = arith.constant 0 : i32
    %c0_i32_2 = arith.constant 0 : i32
    return %c0_i32, %c0_i32_0, %c0_i32_1 : i32, i32, i32
  }
  func.func @transform_5(%arg0: i32) -> (i32, i32) {
    %c0_i32 = arith.constant 0 : i32
    %c0_i32_0 = arith.constant 0 : i32
    %c0_i32_1 = arith.constant 0 : i32
    return %c0_i32, %c0_i32_0 : i32, i32
  }
}

</mosaic_0001>

<bundles_post_ra>
// kernel: tpu_custom_call.1
= control target key start
LH: loop header
LB: loop body
LE: loop exit
PB: predicated region body
PF: predicated region fallthrough
CT: control target
= control target key end

     0   :  { %10 = vsyncpa [#allocation3], 0  ;;  %s751_s0 = inlined_call_operand.hbm [shape: f32[8,128], index: 0, kind: input, shape index: {}]   ;;  %s752_s1 = inlined_call_operand.hbm [shape: f32[3,1,128], index: 1, kind: input, shape index: {}]   ;;  %s753_s2 = inlined_call_operand.vmem [shape: f32[3,1,128], index: 2, kind: input, shape index: {}]   ;;  %s754_s3 = inlined_call_operand.hbm [shape: f32[3,128,128], index: 3, kind: input, shape index: {}]   ;;  %s755_s4 = inlined_call_operand.vmem [shape: f32[3,1,128], index: 4, kind: input, shape index: {}]   ;;  %s756_s5 = inlined_call_operand.hbm [shape: f32[8,128], index: 5, kind: output, shape index: {}]  }
   0x1   :  { %11 = vsyncpa [#allocation6], 0 }
   0x2   :  { %12 = vsyncpa [#allocation4], 0  ;;  %s651_s18 = smov [#allocation5]  }
   0x3   :  { %s28_s19 = sshll.u32 %s651_s18, 4  ;;  %s29_s19 = int_to_ptr.vmem [resolvable:$true] %s28_s19 }
   0x4   :  { %s573_s20 = scalar_lea.vmem %s29_s19, 48  ;;  %s577_s21 = scalar_lea.vmem %s29_s19, 64 }
   0x5   :  { %p574_p0 = scmp.ne.s32.totalorder %s29_s19, %s573_s20  ;;  %p578_p1 = scmp.lt.s32.totalorder %s29_s19, %s29_s19 }
   0x6   :  { %p579_p2 = scmp.lt.s32.totalorder %s577_s21, %s573_s20 }
   0x8   :  { %p580_p3 = por %p579_p2, %p578_p1 }
   0xa   :  { %p581_p4 = pnand %p580_p3, %p574_p0 }
   0xc   :  { %584 = shalt.err (!%p581_p4)
}
   0xd   :  { %s652_s22 = smov 16   ;;  %s653_s23 = smov 1  }
   0xe   :  { %34 = dma.hbm_to_vmem [thread:$0]  %s752_s1, 48, %s29_s19, [#allocation6], %s652_s22, %s652_s22, %s653_s23  }
   0xf   :  { %s654_s26 = smov [#allocation2]   ;;  %s655_s28 = smov [#allocation7]  }
  0x10   :  { %s19_s27 = sshll.u32 %s654_s26, 4  ;;  %s42_s29 = sshll.u32 %s655_s28, 4  ;;  %s20_s27 = int_to_ptr.vmem [resolvable:$true] %s19_s27  ;;  %s43_s29 = int_to_ptr.vmem [resolvable:$true] %s42_s29 }
  0x11   :  { %s593_s30 = scalar_lea.vmem %s20_s27, 128  ;;  %p598_p6 = scmp.lt.s32.totalorder %s20_s27, %s20_s27 }
  0x12   :  { %p594_p5 = scmp.ne.s32.totalorder %s20_s27, %s593_s30  ;;  %p599_p7 = scmp.lt.s32.totalorder %s593_s30, %s593_s30 }
  0x14   :  { %p600_p8 = por %p599_p7, %p598_p6 }
  0x16   :  { %p601_p9 = pnand %p600_p8, %p594_p5 }
  0x18   :  { %604 = shalt.err (!%p601_p9)
}
  0x19   :  { %22 = dma.hbm_to_vmem [thread:$0]  %s751_s0, 128, %s20_s27, [#allocation3]  }
  0x1a   :  { %s613_s8 = scalar_lea.vmem %s43_s29, 6144  ;;  %p618_p11 = scmp.lt.s32.totalorder %s43_s29, %s43_s29 }
  0x1b   :  { %p614_p10 = scmp.ne.s32.totalorder %s43_s29, %s613_s8  ;;  %p619_p12 = scmp.lt.s32.totalorder %s613_s8, %s613_s8 }
  0x1d   :  { %p620_p13 = por %p619_p12, %p618_p11 }
  0x1f   :  { %p621_p0 = pnand %p620_p13, %p614_p10 }
  0x21   :  { %624 = shalt.err (!%p621_p0)
}
  0x22   :  { %s656_s1 = smov 128   ;;  %s657_s9 = smov 8  }
  0x23   :  { %48 = dma.hbm_to_vmem [thread:$0]  %s754_s3, 6144, %s43_s29, [#allocation6], %s656_s1, %s656_s1, %s657_s9  }
  0x24   :  { %645 = dma.done.wait [#allocation3], 128  }
  0x25   :  { %646 = vsyncadd [#allocation3], 4294967168 }
  0x26   :  { %647 = dma.done.wait [#allocation6], 6192  }
  0x27   :  { %648 = vsyncadd [#allocation6], 4294961104  ;;  %v658_v0 = vmov 0.0   ;;  %vm659_vm0 = vmmov 0   ;;  %v121_v1 = vld [vmem:[#allocation7 + $0x70] sm:$0xff]  ;;  %v122_v2 = vld [vmem:[#allocation7 + $0x78] sm:$0xff] }
  0x28   :  { %483 = vmatprep.subr.bf16.mxu0 %v658_v0  ;;  %499 = vmatprep.mubr.msk.bf16.mxu0 %vm659_vm0, %v658_v0  ;;  %v119_v3 = vld [vmem:[#allocation7 + $0x60] sm:$0xff]  ;;  %v130_v4 = vpack.c.bf16 %v122_v2, %v121_v1  ;;  %v120_v5 = vld [vmem:[#allocation7 + $0x68] sm:$0xff]  ;;  %v117_v7 = vld [vmem:[#allocation7 + $0x50] sm:$0xff] }
  0x29   :  { %503 = vmatprep.subr.bf16.mxu1 %v658_v0  ;;  %519 = vmatprep.mubr.msk.bf16.mxu1 %vm659_vm0, %v658_v0  ;;  %v129_v6 = vpack.c.bf16 %v120_v5, %v119_v3  ;;  %v118_v8 = vld [vmem:[#allocation7 + $0x58] sm:$0xff]  ;;  %v115_v11 = vld [vmem:[#allocation7 + $0x40] sm:$0xff]  ;;  %v116_v12 = vld [vmem:[#allocation7 + $0x48] sm:$0xff] }
  0x2a   :  { %484 = vmatpush3.bf16.msra.mxu0 %v130_v4  ;;  %v61_v9 = vld [vmem:[#allocation2] sm:$0xff]  ;;  %v128_v10 = vpack.c.bf16 %v118_v8, %v117_v7  ;;  %v127_v13 = vpack.c.bf16 %v116_v12, %v115_v11  ;;  %v111_v17 = vld [vmem:[#allocation7 + $0x20] sm:$0xff]  ;;  %v112_v18 = vld [vmem:[#allocation7 + $0x28] sm:$0xff] }
  0x2b   :  { %485 = vmatprep.subr.bf16.mxu0 %v658_v0  ;;  %553 = vrsqrt.f32 %v61_v9  ;;  %v113_v14 = vld [vmem:[#allocation7 + $0x30] sm:$0xff]  ;;  %v114_v15 = vld [vmem:[#allocation7 + $0x38] sm:$0xff]  ;;  %v125_v20 = vpack.c.bf16 %v112_v18, %v111_v17  ;;  %vm64_vm1 = vcmp.eq.f32.partialorder %v61_v9, inf  ;;  %v67_v21 = vand.u32 2147483648, %v61_v9  ;;  %v107_v28 = vld [vmem:[#allocation7] sm:$0xff] }
  0x2c   :  { %v126_v16 = vpack.c.bf16 %v114_v15, %v113_v14  ;;  %v109_v22 = vld [vmem:[#allocation7 + $0x10] sm:$0xff]  ;;  %v110_v23 = vld [vmem:[#allocation7 + $0x18] sm:$0xff]  ;;  %vm66_vm2 = vcmp.eq.f32.partialorder %v61_v9, 0.0  ;;  %v108_v29 = vld [vmem:[#allocation7 + $0x8] sm:$0xff] }
  0x2d   :  { %v124_v26 = vpack.c.bf16 %v110_v23, %v109_v22  ;;  %v123_v32 = vpack.c.bf16 %v108_v29, %v107_v28  ;;  %v443_v49 = vld [vmem:[#allocation5] ss:$0 sm:$0xff]  ;;  %v444_v51 = vld [vmem:[%s753_s2] ss:$0 sm:$0xff]  ;;  %v230_v59 = vld [vmem:[#allocation7 + $0xe0] sm:$0xff] }
  0x2e   :  { %486 = vmatpush3.bf16.msra.mxu0 %v129_v6  ;;  %v232_v56 = vld [vmem:[#allocation7 + $0xf0] sm:$0xff]  ;;  %v233_v57 = vld [vmem:[#allocation7 + $0xf8] sm:$0xff]  ;;  %v231_v60 = vld [vmem:[#allocation7 + $0xe8] sm:$0xff] }
  0x2f   :  { %487 = vmatprep.subr.bf16.mxu0 %v658_v0  ;;  %v241_v58 = vpack.c.bf16 %v233_v57, %v232_v56  ;;  %v240_v61 = vpack.c.bf16 %v231_v60, %v230_v59  ;;  %v228_v62 = vld [vmem:[#allocation7 + $0xd0] sm:$0xff]  ;;  %v229_v63 = vld [vmem:[#allocation7 + $0xd8] sm:$0xff]  ;;  %v226_v2 = vld [vmem:[#allocation7 + $0xc0] sm:$0xff] }
  0x30   :  { %v239_v1 = vpack.c.bf16 %v229_v63, %v228_v62  ;;  %v227_v3 = vld [vmem:[#allocation7 + $0xc8] sm:$0xff]  ;;  %v224_v5 = vld [vmem:[#allocation7 + $0xb0] sm:$0xff]  ;;  %v225_v6 = vld [vmem:[#allocation7 + $0xb8] sm:$0xff] }
  0x31   :  { %504 = vmatpush3.bf16.msra.mxu1 %v241_v58  ;;  %v238_v4 = vpack.c.bf16 %v227_v3, %v226_v2  ;;  %v237_v7 = vpack.c.bf16 %v225_v6, %v224_v5  ;;  %v222_v8 = vld [vmem:[#allocation7 + $0xa0] sm:$0xff]  ;;  %v220_v11 = vld [vmem:[#allocation7 + $0x90] sm:$0xff]  ;;  %v221_v12 = vld [vmem:[#allocation7 + $0x98] sm:$0xff] }
  0x32   :  { %488 = vmatpush3.bf16.msra.mxu0 %v128_v10  ;;  %505 = vmatprep.subr.bf16.mxu1 %v658_v0  ;;  %v235_v14 = vpack.c.bf16 %v221_v12, %v220_v11  ;;  %v219_v15 = vld [vmem:[#allocation7 + $0x88] sm:$0xff]  ;;  %v445_v17 = vld [vmem:[%s755_s4] ss:$0 sm:$0xff]  ;;  %v338_v57 = vld [vmem:[#allocation7 + $0x140] sm:$0xff] }
  0x33   :  { %489 = vmatprep.subr.bf16.mxu0 %v658_v0  ;;  %v339_v58 = vld [vmem:[#allocation7 + $0x148] sm:$0xff]  ;;  %v336_v60 = vld [vmem:[#allocation7 + $0x130] sm:$0xff]  ;;  %v334_v63 = vld [vmem:[#allocation7 + $0x120] sm:$0xff] }
  0x34   :  { %v350_v59 = vpack.c.bf16 %v339_v58, %v338_v57  ;;  %v332_v3 = vld [vmem:[#allocation7 + $0x110] sm:$0xff]  ;;  %v330_v6 = vld [vmem:[#allocation7 + $0x100] sm:$0xff] }
  0x35   :  { %506 = vmatpush3.bf16.msra.mxu1 %v240_v61  ;;  %v337_v61 = vld [vmem:[#allocation7 + $0x138] sm:$0xff] }
  0x36   :  { %490 = vmatpush3.bf16.msra.mxu0 %v127_v13  ;;  %507 = vmatprep.subr.bf16.mxu1 %v658_v0  ;;  %v218_v13 = vld [vmem:[#allocation7 + $0x80] sm:$0xff]  ;;  %v349_v62 = vpack.c.bf16 %v337_v61, %v336_v60 }
  0x37   :  { %491 = vmatprep.subr.bf16.mxu0 %v658_v0 }
  0x38   :  { %v554_v19 = vpop.eup %553 }
  0x39   :  { %v63_v24 = vmul.f32 %v554_v19, %v61_v9  ;;  %508 = vmatpush3.bf16.msra.mxu1 %v239_v1  ;;  %v335_v1 = vld [vmem:[#allocation7 + $0x128] sm:$0xff] }
  0x3a   :  { %492 = vmatpush3.bf16.msra.mxu0 %v126_v16  ;;  %509 = vmatprep.subr.bf16.mxu1 %v658_v0  ;;  %v234_v16 = vpack.c.bf16 %v219_v15, %v218_v13  ;;  %v348_v2 = vpack.c.bf16 %v335_v1, %v334_v63 }
  0x3b   :  { %493 = vmatprep.subr.bf16.mxu0 %v658_v0  ;;  %v65_v25 = vsel %vm64_vm1, %v61_v9, %v63_v24  ;;  %v223_v9 = vld [vmem:[#allocation7 + $0xa8] sm:$0xff] }
  0x3c   :  { %v68_v27 = vsel %vm66_vm2, %v67_v21, %v65_v25  ;;  %v236_v10 = vpack.c.bf16 %v223_v9, %v222_v8  ;;  %v450_v9 = vld [vmem:[%s755_s4 + $0x1] ss:$0 sm:$0xff] }
  0x3d   :  { %v69_v30 = vrot.slane %v68_v27, 4  ;;  %510 = vmatpush3.bf16.msra.mxu1 %v238_v4  ;;  %v333_v4 = vld [vmem:[#allocation7 + $0x118] sm:$0xff] }
  0x3e   :  { %494 = vmatpush3.bf16.msra.mxu0 %v125_v20  ;;  %511 = vmatprep.subr.bf16.mxu1 %v658_v0  ;;  %v347_v5 = vpack.c.bf16 %v333_v4, %v332_v3 }
  0x3f   :  { %495 = vmatprep.subr.bf16.mxu0 %v658_v0  ;;  %v70_v31 = vadd.f32 %v69_v30, %v68_v27 }
  0x41   :  { %v71_v33 = vrot.slane %v70_v31, 2  ;;  %512 = vmatpush3.bf16.msra.mxu1 %v237_v7  ;;  %v331_v7 = vld [vmem:[#allocation7 + $0x108] sm:$0xff] }
  0x42   :  { %496 = vmatpush3.bf16.msra.mxu0 %v124_v26  ;;  %513 = vmatprep.subr.bf16.mxu1 %v658_v0  ;;  %v346_v8 = vpack.c.bf16 %v331_v7, %v330_v6 }
  0x43   :  { %497 = vmatprep.subr.bf16.mxu0 %v658_v0  ;;  %v72_v34 = vadd.f32 %v71_v33, %v70_v31 }
  0x45   :  { %v73_v35 = vrot.slane %v72_v34, 1  ;;  %514 = vmatpush3.bf16.msra.mxu1 %v236_v10 }
  0x46   :  { %498 = vmatpush3.bf16.msra.mxu0 %v123_v32  ;;  %515 = vmatprep.subr.bf16.mxu1 %v658_v0 }
  0x47   :  { %523 = vmatprep.subr.bf16.mxu0 %v658_v0  ;;  %v74_v36 = vadd.f32 %v73_v35, %v72_v34 }
  0x49   :  { %v76_v37 = vmul.f32 0.125, %v74_v36  ;;  %516 = vmatpush3.bf16.msra.mxu1 %v235_v14 }
  0x4a   :  { %517 = vmatprep.subr.bf16.mxu1 %v658_v0 }
  0x4b   :  { %v77_v38 = vsub.f32 %v68_v27, %v76_v37 }
  0x4d   :  { %v78_v39 = vmul.f32 %v77_v38, %v77_v38  ;;  %518 = vmatpush3.bf16.msra.mxu1 %v234_v16 }
  0x4f   :  { %v79_v40 = vrot.slane %v78_v39, 4 }
  0x51   :  { %v80_v41 = vadd.f32 %v79_v40, %v78_v39 }
  0x53   :  { %v81_v42 = vrot.slane %v80_v41, 2 }
  0x55   :  { %v82_v43 = vadd.f32 %v81_v42, %v80_v41  ;;  %v446_v41 = vld [vmem:[#allocation5 + $0x1] ss:$0 sm:$0xff] }
  0x57   :  { %v83_v44 = vrot.slane %v82_v43, 1 }
  0x59   :  { %v84_v45 = vadd.f32 %v83_v44, %v82_v43  ;;  %v448_v43 = vld [vmem:[%s753_s2 + $0x1] ss:$0 sm:$0xff] }
  0x5b   :  { %v85_v46 = vmul.f32 0.125, %v84_v45 }
  0x5d   :  { %v86_v47 = vadd.f32 1e-05, %v85_v46 }
  0x5f   :  { %555 = vrsqrt.f32 %v86_v47 }
  0x6c   :  { %v556_v48 = vpop.eup %555 }
  0x6d   :  { %v88_v50 = vmul.f32 %v556_v48, %v77_v38  ;;  %v344_v48 = vld [vmem:[#allocation7 + $0x170] sm:$0xff] }
  0x6f   :  { %v96_v52 = vmul.f32 %v443_v49, %v88_v50  ;;  %v345_v49 = vld [vmem:[#allocation7 + $0x178] sm:$0xff] }
  0x70   :  { %v353_v50 = vpack.c.bf16 %v345_v49, %v344_v48 }
  0x71   :  { %v104_v53 = vadd.f32 %v444_v51, %v96_v52  ;;  %v342_v51 = vld [vmem:[#allocation7 + $0x160] sm:$0xff]  ;;  %v343_v52 = vld [vmem:[#allocation7 + $0x168] sm:$0xff] }
  0x73   :  { %v105_v54 = vmax.f32 %v104_v53, 0.0  ;;  %v352_v53 = vpack.c.bf16 %v343_v52, %v342_v51  ;;  %v402_v51 = vlaneseq }
  0x75   :  { %v106_v55 = vpack.c.bf16 %v105_v54, %v105_v54  ;;  %v340_v54 = vld [vmem:[#allocation7 + $0x150] sm:$0xff] }
  0x77   :  { %500 = vmatmul.mubr.bf16.vlgmr.msra.gmra.mxu0 %v106_v55  ;;  %v341_v55 = vld [vmem:[#allocation7 + $0x158] sm:$0xff] }
  0x78   :  { %539 = vmatprep.mubr.msk.bf16.mxu0 %vm659_vm0, %v658_v0  ;;  %524 = vmatpush3.bf16.msra.mxu0 %v353_v50  ;;  %v351_v56 = vpack.c.bf16 %v341_v55, %v340_v54  ;;  %v403_v55 = vand.u32 127, %v402_v51 }
  0x79   :  { %525 = vmatprep.subr.bf16.mxu0 %v658_v0 }
  0x7a   :  { %vm404_vm4 = vcmp.ge.s32.totalorder %v403_v55, 9 }
  0x7c   :  { %526 = vmatpush3.bf16.msra.mxu0 %v352_v53 }
  0x7d   :  { %527 = vmatprep.subr.bf16.mxu0 %v658_v0 }
  0x80   :  { %528 = vmatpush3.bf16.msra.mxu0 %v351_v56 }
  0x81   :  { %529 = vmatprep.subr.bf16.mxu0 %v658_v0 }
  0x84   :  { %530 = vmatpush3.bf16.msra.mxu0 %v350_v59 }
  0x85   :  { %531 = vmatprep.subr.bf16.mxu0 %v658_v0 }
  0x88   :  { %532 = vmatpush3.bf16.msra.mxu0 %v349_v62 }
  0x89   :  { %533 = vmatprep.subr.bf16.mxu0 %v658_v0 }
  0x8c   :  { %534 = vmatpush3.bf16.msra.mxu0 %v348_v2 }
  0x8d   :  { %535 = vmatprep.subr.bf16.mxu0 %v658_v0 }
  0x90   :  { %536 = vmatpush3.bf16.msra.mxu0 %v347_v5 }
  0x91   :  { %537 = vmatprep.subr.bf16.mxu0 %v658_v0 }
  0x94   :  { %538 = vmatpush3.bf16.msra.mxu0 %v346_v8 }
 0x137   :  { %v172_v18 = vpop.f32.mrf.mxu0 }
 0x138   :  { %v173_v19 = vadd.f32 %v445_v17, %v172_v18 }
 0x139   :  { %v501_v20 = vpop.f32.mrf.mxu0 }
 0x13a   :  { %v178_v21 = vrot.slane %v173_v19, 4 }
 0x13b   :  { %v175_v22 = vpop.f32.mrf.mxu0 }
 0x13c   :  { %v179_v23 = vadd.f32 %v178_v21, %v173_v19 }
 0x13d   :  { %v502_v24 = vpop.f32.mrf.mxu0 }
 0x13e   :  { %v180_v25 = vrot.slane %v179_v23, 2 }
 0x140   :  { %v181_v26 = vadd.f32 %v180_v25, %v179_v23 }
 0x142   :  { %v182_v27 = vrot.slane %v181_v26, 1 }
 0x144   :  { %v183_v28 = vadd.f32 %v182_v27, %v181_v26 }
 0x146   :  { %v184_v29 = vmul.f32 0.125, %v183_v28 }
 0x148   :  { %v185_v30 = vsub.f32 %v173_v19, %v184_v29 }
 0x14a   :  { %v186_v31 = vmul.f32 %v185_v30, %v185_v30 }
 0x14c   :  { %v187_v32 = vrot.slane %v186_v31, 4 }
 0x14e   :  { %v188_v33 = vadd.f32 %v187_v32, %v186_v31  ;;  %v451_v32 = vld [vmem:[#allocation5 + $0x2] ss:$0 sm:$0xff] }
 0x150   :  { %v189_v34 = vrot.slane %v188_v33, 2 }
 0x152   :  { %v190_v35 = vadd.f32 %v189_v34, %v188_v33  ;;  %v453_v34 = vld [vmem:[%s753_s2 + $0x2] ss:$0 sm:$0xff]  ;;  %s660_s2 = smov [#allocation8]  }
 0x154   :  { %v191_v36 = vrot.slane %v190_v35, 1 }
 0x156   :  { %v192_v37 = vadd.f32 %v191_v36, %v190_v35 }
 0x158   :  { %v193_v38 = vmul.f32 0.125, %v192_v37 }
 0x15a   :  { %v194_v39 = vadd.f32 1e-05, %v193_v38 }
 0x15c   :  { %557 = vrsqrt.f32 %v194_v39  ;;  %v455_v39 = vld [vmem:[%s755_s4 + $0x2] ss:$0 sm:$0xff]  ;;  %s433_s4 = sshll.u32 %s660_s2, 4  ;;  %s434_s4 = int_to_ptr.vmem [resolvable:$true] %s433_s4 }
 0x15d   :  { %s625_s22 = scalar_lea.vmem %s434_s4, 128  ;;  %p630_p2 = scmp.lt.s32.totalorder %s434_s4, %s434_s4 }
 0x15e   :  { %p626_p1 = scmp.ne.s32.totalorder %s434_s4, %s625_s22  ;;  %p631_p3 = scmp.lt.s32.totalorder %s625_s22, %s625_s22 }
 0x160   :  { %p632_p4 = por %p631_p3, %p630_p2 }
 0x162   :  { %p633_p5 = pnand %p632_p4, %p626_p1 }
 0x169   :  { %v558_v40 = vpop.eup %557 }
 0x16a   :  { %v196_v42 = vmul.f32 %v558_v40, %v185_v30 }
 0x16c   :  { %v205_v44 = vmul.f32 %v446_v41, %v196_v42 }
 0x16e   :  { %v214_v45 = vadd.f32 %v448_v43, %v205_v44 }
 0x170   :  { %v215_v46 = vmax.f32 %v214_v45, 0.0 }
 0x172   :  { %v216_v47 = vpack.c.bf16 %v215_v46, %v215_v46 }
 0x174   :  { %520 = vmatmul.mubr.bf16.vlgmr.msra.gmra.mxu1 %v216_v47 }
 0x234   :  { %v284_v10 = vpop.f32.mrf.mxu1 }
 0x235   :  { %v285_v11 = vadd.f32 %v450_v9, %v284_v10 }
 0x236   :  { %v521_v12 = vpop.f32.mrf.mxu1 }
 0x237   :  { %v290_v13 = vrot.slane %v285_v11, 4 }
 0x238   :  { %v287_v14 = vpop.f32.mrf.mxu1 }
 0x239   :  { %v291_v15 = vadd.f32 %v290_v13, %v285_v11 }
 0x23a   :  { %v522_v16 = vpop.f32.mrf.mxu1 }
 0x23b   :  { %v292_v17 = vrot.slane %v291_v15, 2 }
 0x23d   :  { %v293_v18 = vadd.f32 %v292_v17, %v291_v15 }
 0x23f   :  { %v294_v19 = vrot.slane %v293_v18, 1 }
 0x241   :  { %v295_v20 = vadd.f32 %v294_v19, %v293_v18 }
 0x243   :  { %v296_v21 = vmul.f32 0.125, %v295_v20 }
 0x245   :  { %v297_v22 = vsub.f32 %v285_v11, %v296_v21 }
 0x247   :  { %v298_v23 = vmul.f32 %v297_v22, %v297_v22 }
 0x249   :  { %v299_v0 = vrot.slane %v298_v23, 4 }
 0x24b   :  { %v300_v24 = vadd.f32 %v299_v0, %v298_v23 }
 0x24d   :  { %v301_v25 = vrot.slane %v300_v24, 2 }
 0x24f   :  { %v302_v26 = vadd.f32 %v301_v25, %v300_v24 }
 0x251   :  { %v303_v27 = vrot.slane %v302_v26, 1 }
 0x253   :  { %v304_v28 = vadd.f32 %v303_v27, %v302_v26 }
 0x255   :  { %v305_v29 = vmul.f32 0.125, %v304_v28 }
 0x257   :  { %v306_v30 = vadd.f32 1e-05, %v305_v29 }
 0x259   :  { %559 = vrsqrt.f32 %v306_v30 }
 0x266   :  { %v560_v31 = vpop.eup %559 }
 0x267   :  { %v308_v33 = vmul.f32 %v560_v31, %v297_v22 }
 0x269   :  { %v317_v35 = vmul.f32 %v451_v32, %v308_v33 }
 0x26b   :  { %v326_v36 = vadd.f32 %v453_v34, %v317_v35 }
 0x26d   :  { %v327_v37 = vmax.f32 %v326_v36, 0.0 }
 0x26f   :  { %v328_v38 = vpack.c.bf16 %v327_v37, %v327_v37 }
 0x271   :  { %540 = vmatmul.mubr.bf16.vlgmr.msra.gmra.mxu0 %v328_v38 }
 0x331   :  { %v396_v40 = vpop.f32.mrf.mxu0 }
 0x332   :  { %v397_v41 = vadd.f32 %v455_v39, %v396_v40 }
 0x333   :  { %v541_v42 = vpop.f32.mrf.mxu0 }
 0x334   :  { %v408_v43 = vand.u32 2147483647, %v397_v41  ;;  %v405_v58 = vmax.f32 %v397_v41, 0.0  ;;  %vm406_vm5 = vcmp.ne.f32.partialorder %v397_v41, %v397_v41 }
 0x335   :  { %v399_v44 = vpop.f32.mrf.mxu0 }
 0x336   :  { %v409_v45 = vsub.f32 0.0, %v408_v43 }
 0x337   :  { %v542_v46 = vpop.f32.mrf.mxu0 }
 0x338   :  { %v410_v47 = vmul.f32 1.442695, %v409_v45 }
 0x33a   :  { %561 = vpow2.f32 %v410_v47 }
 0x347   :  { %v562_v48 = vpop.eup %561 }
 0x348   :  { %v412_v49 = vadd.f32 1.0, %v562_v48  ;;  %v415_v50 = vmul.f32 -0.5, %v562_v48  ;;  %v418_v53 = vand.u32 2147483647, %v562_v48 }
 0x34a   :  { %563 = vlog2.f32 %v412_v49  ;;  %v416_v52 = vadd.f32 1.0, %v415_v50  ;;  %vm419_vm3 = vcmp.lt.f32.partialorder %v418_v53, 0.0004427343 }
 0x34c   :  { %v417_v57 = vmul.f32 %v562_v48, %v416_v52 }
 0x357   :  { %v564_v54 = vpop.eup %563 }
 0x358   :  { %v414_v56 = vmul.f32 0.6931472, %v564_v54 }
 0x35a   :  { %v420_v59 = vsel %vm419_vm3, %v417_v57, %v414_v56 }
 0x35b   :  { %v421_v60 = vadd.f32 %v420_v59, %v405_v58 }
 0x35d   :  { %v422_v61 = vsel %vm406_vm5, %v397_v41, %v421_v60 }
 0x35e   :  { %v425_v62 = vsel %vm404_vm4, %v422_v61, %v397_v41 }
 0x35f   :  { %426 = vst [vmem:[#allocation8] sm:$0xff] %v425_v62 }
 0x360   :  { %636 = shalt.err (!%p633_p5)
}
 0x361   :  { %436 = dma.vmem_to_hbm [thread:$0]  %s434_s4, 128, %s756_s5, [#allocation4]  }
 0x362   :  { %649 = dma.done.wait [#allocation4], 128  }
 0x363   :  { %650 = vsyncadd [#allocation4], 4294967168 }
 0x364   :  { %440 = vsyncpa [#allocation3], 1 }
 0x365   :  { %441 = vsyncpa [#allocation6], 1 }
 0x366   :  { %442 = vsyncpa [#allocation4], 1 }

</bundles_post_ra>
